<compile_context>
chip_gen: v7x
topology: tpu7x:2x2x1
jax: 0.10.0
libtpu: 0.0.40
codegen_flags: <defaults>
</compile_context>

<pallas_src>
import math
import functools

import jax
import jax.numpy as jnp
from jax import lax
from jax.experimental import pallas as pl
from jax.experimental.pallas import tpu as pltpu

_NEG_INF = -1000000.0  # same fill value as the torch masked_softmax


def _attn_addnorm_kernel(x_ref, wq_ref, wk_ref, wv_ref, wo_ref, mask_ref,
                         g1_ref, beta1_ref, y_ref, *, num_heads, eps):
    """Per-batch-element multi-head self-attention + W_o projection + AddNorm1."""
    x = x_ref[0].astype(jnp.float32)            # (S, H)
    mask = mask_ref[0]                          # (1, S)  1.0 = attend, 0.0 = masked
    S, H = x.shape
    dh = H // num_heads
    scale = 1.0 / math.sqrt(dh)

    q = jnp.dot(x, wq_ref[...], preferred_element_type=jnp.float32)   # (S, H)
    k = jnp.dot(x, wk_ref[...], preferred_element_type=jnp.float32)
    v = jnp.dot(x, wv_ref[...], preferred_element_type=jnp.float32)
    wo = wo_ref[...]

    # Per-head attention; accumulate each head's context directly into the W_o
    # projection (attn @ W_o == sum_h ctx_h @ W_o[h*dh:(h+1)*dh, :]).
    o = jnp.zeros((S, H), jnp.float32)
    for h in range(num_heads):
        sl = slice(h * dh, (h + 1) * dh)
        qh, kh, vh = q[:, sl], k[:, sl], v[:, sl]
        # scores = qh @ kh.T / sqrt(dh)
        scores = lax.dot_general(qh, kh, (((1,), (1,)), ((), ())),
                                 preferred_element_type=jnp.float32) * scale
        scores = jnp.where(mask > 0.0, scores, _NEG_INF)
        m = jnp.max(scores, axis=-1, keepdims=True)
        p = jnp.exp(scores - m)
        w = p / jnp.sum(p, axis=-1, keepdims=True)
        ctx = jnp.dot(w, vh, preferred_element_type=jnp.float32)          # (S, dh)
        o = o + jnp.dot(ctx, wo[sl, :], preferred_element_type=jnp.float32)

    # AddNorm1.  Dropout is identity in eval mode.
    # TODO(synk): training-mode dropout needs the TPU hardware PRNG; omitted so the
    # kernel also lowers under the interpret/CPU check.
    z = o + x
    mu = jnp.mean(z, axis=-1, keepdims=True)
    var = jnp.mean((z - mu) ** 2, axis=-1, keepdims=True)
    zn = (z - mu) * lax.rsqrt(var + eps)
    y_ref[0] = (zn * g1_ref[...] + beta1_ref[...]).astype(y_ref.dtype)


def _ffn_addnorm_kernel(y_ref, w1_ref, b1_ref, w2_ref, b2_ref,
                        g2_ref, beta2_ref, o_ref, *, eps):
    """Row-tiled PositionWiseFFN + AddNorm2 on the flattened (B*S, H) slab."""
    y = y_ref[...].astype(jnp.float32)          # (R, H)
    h = jnp.dot(y, w1_ref[...], preferred_element_type=jnp.float32) + b1_ref[...]
    h = jnp.maximum(h, 0.0)
    f = jnp.dot(h, w2_ref[...], preferred_element_type=jnp.float32) + b2_ref[...]
    z = f + y
    mu = jnp.mean(z, axis=-1, keepdims=True)
    var = jnp.mean((z - mu) ** 2, axis=-1, keepdims=True)
    zn = (z - mu) * lax.rsqrt(var + eps)
    o_ref[...] = (zn * g2_ref[...] + beta2_ref[...]).astype(o_ref.dtype)


def _pick_row_block(rows, cap=512):
    """Largest row tile <= cap that evenly divides rows (full slab if small)."""
    if rows <= cap:
        return rows
    for cand in range(cap, 7, -8):
        if rows % cand == 0:
            return cand
    return rows


def encoder_block(x, valid_lens, params, *, num_heads, dropout_p=0.0, eps=1e-5):
    """Eval-mode EncoderBlock forward.  x: (B, S, H) float32, valid_lens: (B,) int."""
    del dropout_p  # eval mode: all Dropout layers are identity
    B, S, H = x.shape
    assert H % num_heads == 0

    wq, wk, wv, wo = params["wq"], params["wk"], params["wv"], params["wo"]
    w1, b1, w2, b2 = params["w1"], params["b1"], params["w2"], params["b2"]
    g1, beta1, g2, beta2 = params["g1"], params["beta1"], params["g2"], params["beta2"]
    F = w1.shape[1]

    # Key-position mask (1.0 = attend), shared by every head of a batch element.
    if valid_lens is None:
        mask = jnp.ones((B, 1, S), jnp.float32)
    else:
        mask = (jnp.arange(S, dtype=jnp.int32)[None, :]
                < valid_lens.astype(jnp.int32)[:, None]).astype(jnp.float32)[:, None, :]

    row2 = lambda a: a.reshape(1, -1)  # 1-D params -> lane-dense (1, N)

    # ---- kernel 1: multi-head attention + AddNorm1, grid over batch ----
    k1 = functools.partial(_attn_addnorm_kernel, num_heads=num_heads, eps=eps)
    y = pl.pallas_call(
        k1,
        out_shape=jax.ShapeDtypeStruct((B, S, H), x.dtype),
        grid=(B,),
        in_specs=[
            pl.BlockSpec((1, S, H), lambda b: (b, 0, 0)),
            pl.BlockSpec((H, H), lambda b: (0, 0)),   # weights: constant block index
            pl.BlockSpec((H, H), lambda b: (0, 0)),   #   -> stay VMEM-resident
            pl.BlockSpec((H, H), lambda b: (0, 0)),
            pl.BlockSpec((H, H), lambda b: (0, 0)),
            pl.BlockSpec((1, 1, S), lambda b: (b, 0, 0)),
            pl.BlockSpec((1, H), lambda b: (0, 0)),
            pl.BlockSpec((1, H), lambda b: (0, 0)),
        ],
        out_specs=pl.BlockSpec((1, S, H), lambda b: (b, 0, 0)),
        compiler_params=pltpu.CompilerParams(dimension_semantics=("parallel",)),
    )(x, wq, wk, wv, wo, mask, row2(g1), row2(beta1))

    # ---- kernel 2: FFN + AddNorm2 on the lane-dense flattened (B*S, H) slab ----
    rows = B * S
    rb = _pick_row_block(rows)
    y2d = y.reshape(rows, H)
    k2 = functools.partial(_ffn_addnorm_kernel, eps=eps)
    out2d = pl.pallas_call(
        k2,
        out_shape=jax.ShapeDtypeStruct((rows, H), x.dtype),
        grid=(rows // rb,),
        in_specs=[
            pl.BlockSpec((rb, H), lambda i: (i, 0)),
            pl.BlockSpec((H, F), lambda i: (0, 0)),
            pl.BlockSpec((1, F), lambda i: (0, 0)),
            pl.BlockSpec((F, H), lambda i: (0, 0)),
            pl.BlockSpec((1, H), lambda i: (0, 0)),
            pl.BlockSpec((1, H), lambda i: (0, 0)),
            pl.BlockSpec((1, H), lambda i: (0, 0)),
        ],
        out_specs=pl.BlockSpec((rb, H), lambda i: (i, 0)),
        compiler_params=pltpu.CompilerParams(dimension_semantics=("parallel",)),
    )(y2d, w1, row2(b1), w2, row2(b2), row2(g2), row2(beta2))

    return out2d.reshape(B, S, H)


# ---------------------------- pure-JAX reference ----------------------------

def _layer_norm_ref(z, g, b, eps):
    mu = z.mean(-1, keepdims=True)
    var = ((z - mu) ** 2).mean(-1, keepdims=True)
    return (z - mu) / jnp.sqrt(var + eps) * g + b


def encoder_block_ref(x, valid_lens, params, *, num_heads, eps=1e-5):
    B, S, H = x.shape
    dh = H // num_heads
    q, k, v = x @ params["wq"], x @ params["wk"], x @ params["wv"]

    def split(t):
        return t.reshape(B, S, num_heads, dh).transpose(0, 2, 1, 3)

    qh, kh, vh = split(q), split(k), split(v)
    scores = jnp.einsum("bhqd,bhkd->bhqk", qh, kh) / math.sqrt(dh)
    if valid_lens is not None:
        m = jnp.arange(S)[None, :] < valid_lens[:, None]
        scores = jnp.where(m[:, None, None, :], scores, _NEG_INF)
    w = jax.nn.softmax(scores, axis=-1)
    ctx = jnp.einsum("bhqk,bhkd->bhqd", w, vh).transpose(0, 2, 1, 3).reshape(B, S, H)
    o = ctx @ params["wo"]
    y = _layer_norm_ref(o + x, params["g1"], params["beta1"], eps)
    f = jnp.maximum(y @ params["w1"] + params["b1"], 0.0) @ params["w2"] + params["b2"]
    return _layer_norm_ref(f + y, params["g2"], params["beta2"], eps)


if __name__ == "__main__":
    B, S, H = 2, 8, 32          # batch=2, seq=8, num_hiddens=32
    num_heads, F = 4, 64        # 4 heads, ffn_num_hiddens=64, norm_shape=(32,)

    key = jax.random.PRNGKey(0)
    keys = jax.random.split(key, 9)
    sc = 0.1
    x = jax.random.normal(keys[0], (B, S, H), jnp.float32)
    valid_lens = jnp.array([8, 5], jnp.int32)

    params = dict(
        wq=sc * jax.random.normal(keys[1], (H, H), jnp.float32),
        wk=sc * jax.random.normal(keys[2], (H, H), jnp.float32),
        wv=sc * jax.random.normal(keys[3], (H, H), jnp.float32),
        wo=sc * jax.random.normal(keys[4], (H, H), jnp.float32),
        w1=sc * jax.random.normal(keys[5], (H, F), jnp.float32),
        b1=sc * jax.random.normal(keys[6], (F,), jnp.float32),
        w2=sc * jax.random.normal(keys[7], (F, H), jnp.float32),
        b2=sc * jax.random.normal(keys[8], (H,), jnp.float32),
        g1=jnp.ones((H,), jnp.float32), beta1=jnp.zeros((H,), jnp.float32),
        g2=jnp.ones((H,), jnp.float32), beta2=jnp.zeros((H,), jnp.float32),
    )

    out = encoder_block(x, valid_lens, params, num_heads=num_heads, dropout_p=0.0)
    out = jax.block_until_ready(out)

    ref = encoder_block_ref(x, valid_lens, params, num_heads=num_heads)
    assert out.shape == (B, S, H)
    err = float(jnp.max(jnp.abs(out - ref)))
    assert jnp.allclose(out, ref, atol=1e-4, rtol=1e-4), f"mismatch vs reference: max|d|={err}"

    print("KERNEL_OK")
</pallas_src>

<mosaic_0001>
module attributes {stable_mosaic.version = 11 : i64} {
  func.func @_attn_addnorm_kernel(%arg0: i32, %arg1: memref<1x8x32xf32, #tpu.memory_space<vmem>>, %arg2: memref<32x32xf32, #tpu.memory_space<vmem>>, %arg3: memref<32x32xf32, #tpu.memory_space<vmem>>, %arg4: memref<32x32xf32, #tpu.memory_space<vmem>>, %arg5: memref<32x32xf32, #tpu.memory_space<vmem>>, %arg6: memref<1x1x8xf32, #tpu.memory_space<vmem>>, %arg7: memref<1x32xf32, #tpu.memory_space<vmem>>, %arg8: memref<1x32xf32, #tpu.memory_space<vmem>>, %arg9: memref<1x8x32xf32, #tpu.memory_space<vmem>>) attributes {dimension_semantics = [#tpu.dimension_semantics<parallel>], iteration_bounds = array<i64: 2>, scalar_prefetch = 0 : i64, scratch_operands = 0 : i64, tpu.core_type = #tpu.core_type<tc>, window_params = [{transform_indices = @transform_0, window_bounds = array<i64: 1, 8, 32>}, {pipeline_mode = #tpu.pipeline_mode<synchronous>, transform_indices = @transform_1, window_bounds = array<i64: 32, 32>}, {pipeline_mode = #tpu.pipeline_mode<synchronous>, transform_indices = @transform_2, window_bounds = array<i64: 32, 32>}, {pipeline_mode = #tpu.pipeline_mode<synchronous>, transform_indices = @transform_3, window_bounds = array<i64: 32, 32>}, {pipeline_mode = #tpu.pipeline_mode<synchronous>, transform_indices = @transform_4, window_bounds = array<i64: 32, 32>}, {transform_indices = @transform_5, window_bounds = array<i64: 1, 1, 8>}, {pipeline_mode = #tpu.pipeline_mode<synchronous>, transform_indices = @transform_6, window_bounds = array<i64: 1, 32>}, {pipeline_mode = #tpu.pipeline_mode<synchronous>, transform_indices = @transform_7, window_bounds = array<i64: 1, 32>}, {transform_indices = @transform_8, window_bounds = array<i64: 1, 8, 32>}]} {
    %c0 = arith.constant 0 : index
    %c0_0 = arith.constant 0 : index
    %c0_1 = arith.constant 0 : index
    %0 = vector.load %arg1[%c0, %c0_0, %c0_1] : memref<1x8x32xf32, #tpu.memory_space<vmem>>, vector<1x8x32xf32>
    %1 = vector.shape_cast %0 : vector<1x8x32xf32> to vector<8x32xf32>
    %c0_2 = arith.constant 0 : index
    %c0_3 = arith.constant 0 : index
    %c0_4 = arith.constant 0 : index
    %2 = vector.load %arg6[%c0_2, %c0_3, %c0_4] : memref<1x1x8xf32, #tpu.memory_space<vmem>>, vector<1x1x8xf32>
    %3 = vector.shape_cast %2 : vector<1x1x8xf32> to vector<1x8xf32>
    %c0_5 = arith.constant 0 : index
    %c0_6 = arith.constant 0 : index
    %4 = vector.load %arg2[%c0_5, %c0_6] : memref<32x32xf32, #tpu.memory_space<vmem>>, vector<32x32xf32>
    %cst = arith.constant dense<0.000000e+00> : vector<8x32xf32>
    %5 = tpu.matmul %1, %4, %cst {dimension_numbers = #tpu.dot_dimension_numbers<[1], [0], [0], [1], [0, 0, 1, 1], [], []>} : vector<8x32xf32>, vector<32x32xf32>, vector<8x32xf32> -> vector<8x32xf32>
    %c0_7 = arith.constant 0 : index
    %c0_8 = arith.constant 0 : index
    %6 = vector.load %arg3[%c0_7, %c0_8] : memref<32x32xf32, #tpu.memory_space<vmem>>, vector<32x32xf32>
    %cst_9 = arith.constant dense<0.000000e+00> : vector<8x32xf32>
    %7 = tpu.matmul %1, %6, %cst_9 {dimension_numbers = #tpu.dot_dimension_numbers<[1], [0], [0], [1], [0, 0, 1, 1], [], []>} : vector<8x32xf32>, vector<32x32xf32>, vector<8x32xf32> -> vector<8x32xf32>
    %c0_10 = arith.constant 0 : index
    %c0_11 = arith.constant 0 : index
    %8 = vector.load %arg4[%c0_10, %c0_11] : memref<32x32xf32, #tpu.memory_space<vmem>>, vector<32x32xf32>
    %cst_12 = arith.constant dense<0.000000e+00> : vector<8x32xf32>
    %9 = tpu.matmul %1, %8, %cst_12 {dimension_numbers = #tpu.dot_dimension_numbers<[1], [0], [0], [1], [0, 0, 1, 1], [], []>} : vector<8x32xf32>, vector<32x32xf32>, vector<8x32xf32> -> vector<8x32xf32>
    %c0_13 = arith.constant 0 : index
    %c0_14 = arith.constant 0 : index
    %10 = vector.load %arg5[%c0_13, %c0_14] : memref<32x32xf32, #tpu.memory_space<vmem>>, vector<32x32xf32>
    %cst_15 = arith.constant 0.000000e+00 : f32
    %11 = vector.broadcast %cst_15 : f32 to vector<8x32xf32>
    %12 = vector.extract_strided_slice %5 {offsets = [0, 0], sizes = [8, 8], strides = [1, 1]} : vector<8x32xf32> to vector<8x8xf32>
    %13 = vector.extract_strided_slice %7 {offsets = [0, 0], sizes = [8, 8], strides = [1, 1]} : vector<8x32xf32> to vector<8x8xf32>
    %14 = vector.extract_strided_slice %9 {offsets = [0, 0], sizes = [8, 8], strides = [1, 1]} : vector<8x32xf32> to vector<8x8xf32>
    %cst_16 = arith.constant dense<0.000000e+00> : vector<8x8xf32>
    %15 = tpu.matmul %12, %13, %cst_16 {dimension_numbers = #tpu.dot_dimension_numbers<[1], [1], [0], [0], [0, 0, 1, 0], [], []>} : vector<8x8xf32>, vector<8x8xf32>, vector<8x8xf32> -> vector<8x8xf32>
    %cst_17 = arith.constant 0.353553385 : f32
    %16 = vector.broadcast %cst_17 : f32 to vector<8x8xf32>
    %17 = arith.mulf %15, %16 : vector<8x8xf32>
    %cst_18 = arith.constant 0.000000e+00 : f32
    %18 = vector.broadcast %cst_18 : f32 to vector<1x8xf32>
    %19 = arith.cmpf ogt, %3, %18 : vector<1x8xf32>
    %cst_19 = arith.constant -1.000000e+06 : f32
    %20 = vector.shape_cast %19 : vector<1x8xi1> to vector<1x8xi1>
    %21 = vector.broadcast %20 : vector<1x8xi1> to vector<8x8xi1>
    %22 = vector.broadcast %cst_19 : f32 to vector<8x8xf32>
    %23 = arith.select %21, %17, %22 : vector<8x8xi1>, vector<8x8xf32>
    %cst_20 = arith.constant dense<0xFF800000> : vector<8xf32>
    %24 = vector.multi_reduction <maximumf>, %23, %cst_20 [1] : vector<8x8xf32> to vector<8xf32>
    %25 = vector.shape_cast %24 : vector<8xf32> to vector<8x1xf32>
    %26 = vector.broadcast %25 : vector<8x1xf32> to vector<8x8xf32>
    %27 = arith.subf %23, %26 : vector<8x8xf32>
    %28 = math.exp %27 : vector<8x8xf32>
    %cst_21 = arith.constant dense<0.000000e+00> : vector<8xf32>
    %29 = vector.multi_reduction <add>, %28, %cst_21 [1] : vector<8x8xf32> to vector<8xf32>
    %30 = vector.shape_cast %29 : vector<8xf32> to vector<8x1xf32>
    %31 = vector.broadcast %30 : vector<8x1xf32> to vector<8x8xf32>
    %32 = arith.divf %28, %31 : vector<8x8xf32>
    %cst_22 = arith.constant dense<0.000000e+00> : vector<8x8xf32>
    %33 = tpu.matmul %32, %14, %cst_22 {dimension_numbers = #tpu.dot_dimension_numbers<[1], [0], [0], [1], [0, 0, 1, 1], [], []>} : vector<8x8xf32>, vector<8x8xf32>, vector<8x8xf32> -> vector<8x8xf32>
    %34 = vector.extract_strided_slice %10 {offsets = [0, 0], sizes = [8, 32], strides = [1, 1]} : vector<32x32xf32> to vector<8x32xf32>
    %cst_23 = arith.constant dense<0.000000e+00> : vector<8x32xf32>
    %35 = tpu.matmul %33, %34, %cst_23 {dimension_numbers = #tpu.dot_dimension_numbers<[1], [0], [0], [1], [0, 0, 1, 1], [], []>} : vector<8x8xf32>, vector<8x32xf32>, vector<8x32xf32> -> vector<8x32xf32>
    %36 = arith.addf %11, %35 : vector<8x32xf32>
    %37 = vector.extract_strided_slice %5 {offsets = [0, 8], sizes = [8, 8], strides = [1, 1]} : vector<8x32xf32> to vector<8x8xf32>
    %38 = vector.extract_strided_slice %7 {offsets = [0, 8], sizes = [8, 8], strides = [1, 1]} : vector<8x32xf32> to vector<8x8xf32>
    %39 = vector.extract_strided_slice %9 {offsets = [0, 8], sizes = [8, 8], strides = [1, 1]} : vector<8x32xf32> to vector<8x8xf32>
    %cst_24 = arith.constant dense<0.000000e+00> : vector<8x8xf32>
    %40 = tpu.matmul %37, %38, %cst_24 {dimension_numbers = #tpu.dot_dimension_numbers<[1], [1], [0], [0], [0, 0, 1, 0], [], []>} : vector<8x8xf32>, vector<8x8xf32>, vector<8x8xf32> -> vector<8x8xf32>
    %cst_25 = arith.constant 0.353553385 : f32
    %41 = vector.broadcast %cst_25 : f32 to vector<8x8xf32>
    %42 = arith.mulf %40, %41 : vector<8x8xf32>
    %cst_26 = arith.constant 0.000000e+00 : f32
    %43 = vector.broadcast %cst_26 : f32 to vector<1x8xf32>
    %44 = arith.cmpf ogt, %3, %43 : vector<1x8xf32>
    %cst_27 = arith.constant -1.000000e+06 : f32
    %45 = vector.shape_cast %44 : vector<1x8xi1> to vector<1x8xi1>
    %46 = vector.broadcast %45 : vector<1x8xi1> to vector<8x8xi1>
    %47 = vector.broadcast %cst_27 : f32 to vector<8x8xf32>
    %48 = arith.select %46, %42, %47 : vector<8x8xi1>, vector<8x8xf32>
    %cst_28 = arith.constant dense<0xFF800000> : vector<8xf32>
    %49 = vector.multi_reduction <maximumf>, %48, %cst_28 [1] : vector<8x8xf32> to vector<8xf32>
    %50 = vector.shape_cast %49 : vector<8xf32> to vector<8x1xf32>
    %51 = vector.broadcast %50 : vector<8x1xf32> to vector<8x8xf32>
    %52 = arith.subf %48, %51 : vector<8x8xf32>
    %53 = math.exp %52 : vector<8x8xf32>
    %cst_29 = arith.constant dense<0.000000e+00> : vector<8xf32>
    %54 = vector.multi_reduction <add>, %53, %cst_29 [1] : vector<8x8xf32> to vector<8xf32>
    %55 = vector.shape_cast %54 : vector<8xf32> to vector<8x1xf32>
    %56 = vector.broadcast %55 : vector<8x1xf32> to vector<8x8xf32>
    %57 = arith.divf %53, %56 : vector<8x8xf32>
    %cst_30 = arith.constant dense<0.000000e+00> : vector<8x8xf32>
    %58 = tpu.matmul %57, %39, %cst_30 {dimension_numbers = #tpu.dot_dimension_numbers<[1], [0], [0], [1], [0, 0, 1, 1], [], []>} : vector<8x8xf32>, vector<8x8xf32>, vector<8x8xf32> -> vector<8x8xf32>
    %59 = vector.extract_strided_slice %10 {offsets = [8, 0], sizes = [8, 32], strides = [1, 1]} : vector<32x32xf32> to vector<8x32xf32>
    %cst_31 = arith.constant dense<0.000000e+00> : vector<8x32xf32>
    %60 = tpu.matmul %58, %59, %cst_31 {dimension_numbers = #tpu.dot_dimension_numbers<[1], [0], [0], [1], [0, 0, 1, 1], [], []>} : vector<8x8xf32>, vector<8x32xf32>, vector<8x32xf32> -> vector<8x32xf32>
    %61 = arith.addf %36, %60 : vector<8x32xf32>
    %62 = vector.extract_strided_slice %5 {offsets = [0, 16], sizes = [8, 8], strides = [1, 1]} : vector<8x32xf32> to vector<8x8xf32>
    %63 = vector.extract_strided_slice %7 {offsets = [0, 16], sizes = [8, 8], strides = [1, 1]} : vector<8x32xf32> to vector<8x8xf32>
    %64 = vector.extract_strided_slice %9 {offsets = [0, 16], sizes = [8, 8], strides = [1, 1]} : vector<8x32xf32> to vector<8x8xf32>
    %cst_32 = arith.constant dense<0.000000e+00> : vector<8x8xf32>
    %65 = tpu.matmul %62, %63, %cst_32 {dimension_numbers = #tpu.dot_dimension_numbers<[1], [1], [0], [0], [0, 0, 1, 0], [], []>} : vector<8x8xf32>, vector<8x8xf32>, vector<8x8xf32> -> vector<8x8xf32>
    %cst_33 = arith.constant 0.353553385 : f32
    %66 = vector.broadcast %cst_33 : f32 to vector<8x8xf32>
    %67 = arith.mulf %65, %66 : vector<8x8xf32>
    %cst_34 = arith.constant 0.000000e+00 : f32
    %68 = vector.broadcast %cst_34 : f32 to vector<1x8xf32>
    %69 = arith.cmpf ogt, %3, %68 : vector<1x8xf32>
    %cst_35 = arith.constant -1.000000e+06 : f32
    %70 = vector.shape_cast %69 : vector<1x8xi1> to vector<1x8xi1>
    %71 = vector.broadcast %70 : vector<1x8xi1> to vector<8x8xi1>
    %72 = vector.broadcast %cst_35 : f32 to vector<8x8xf32>
    %73 = arith.select %71, %67, %72 : vector<8x8xi1>, vector<8x8xf32>
    %cst_36 = arith.constant dense<0xFF800000> : vector<8xf32>
    %74 = vector.multi_reduction <maximumf>, %73, %cst_36 [1] : vector<8x8xf32> to vector<8xf32>
    %75 = vector.shape_cast %74 : vector<8xf32> to vector<8x1xf32>
    %76 = vector.broadcast %75 : vector<8x1xf32> to vector<8x8xf32>
    %77 = arith.subf %73, %76 : vector<8x8xf32>
    %78 = math.exp %77 : vector<8x8xf32>
    %cst_37 = arith.constant dense<0.000000e+00> : vector<8xf32>
    %79 = vector.multi_reduction <add>, %78, %cst_37 [1] : vector<8x8xf32> to vector<8xf32>
    %80 = vector.shape_cast %79 : vector<8xf32> to vector<8x1xf32>
    %81 = vector.broadcast %80 : vector<8x1xf32> to vector<8x8xf32>
    %82 = arith.divf %78, %81 : vector<8x8xf32>
    %cst_38 = arith.constant dense<0.000000e+00> : vector<8x8xf32>
    %83 = tpu.matmul %82, %64, %cst_38 {dimension_numbers = #tpu.dot_dimension_numbers<[1], [0], [0], [1], [0, 0, 1, 1], [], []>} : vector<8x8xf32>, vector<8x8xf32>, vector<8x8xf32> -> vector<8x8xf32>
    %84 = vector.extract_strided_slice %10 {offsets = [16, 0], sizes = [8, 32], strides = [1, 1]} : vector<32x32xf32> to vector<8x32xf32>
    %cst_39 = arith.constant dense<0.000000e+00> : vector<8x32xf32>
    %85 = tpu.matmul %83, %84, %cst_39 {dimension_numbers = #tpu.dot_dimension_numbers<[1], [0], [0], [1], [0, 0, 1, 1], [], []>} : vector<8x8xf32>, vector<8x32xf32>, vector<8x32xf32> -> vector<8x32xf32>
    %86 = arith.addf %61, %85 : vector<8x32xf32>
    %87 = vector.extract_strided_slice %5 {offsets = [0, 24], sizes = [8, 8], strides = [1, 1]} : vector<8x32xf32> to vector<8x8xf32>
    %88 = vector.extract_strided_slice %7 {offsets = [0, 24], sizes = [8, 8], strides = [1, 1]} : vector<8x32xf32> to vector<8x8xf32>
    %89 = vector.extract_strided_slice %9 {offsets = [0, 24], sizes = [8, 8], strides = [1, 1]} : vector<8x32xf32> to vector<8x8xf32>
    %cst_40 = arith.constant dense<0.000000e+00> : vector<8x8xf32>
    %90 = tpu.matmul %87, %88, %cst_40 {dimension_numbers = #tpu.dot_dimension_numbers<[1], [1], [0], [0], [0, 0, 1, 0], [], []>} : vector<8x8xf32>, vector<8x8xf32>, vector<8x8xf32> -> vector<8x8xf32>
    %cst_41 = arith.constant 0.353553385 : f32
    %91 = vector.broadcast %cst_41 : f32 to vector<8x8xf32>
    %92 = arith.mulf %90, %91 : vector<8x8xf32>
    %cst_42 = arith.constant 0.000000e+00 : f32
    %93 = vector.broadcast %cst_42 : f32 to vector<1x8xf32>
    %94 = arith.cmpf ogt, %3, %93 : vector<1x8xf32>
    %cst_43 = arith.constant -1.000000e+06 : f32
    %95 = vector.shape_cast %94 : vector<1x8xi1> to vector<1x8xi1>
    %96 = vector.broadcast %95 : vector<1x8xi1> to vector<8x8xi1>
    %97 = vector.broadcast %cst_43 : f32 to vector<8x8xf32>
    %98 = arith.select %96, %92, %97 : vector<8x8xi1>, vector<8x8xf32>
    %cst_44 = arith.constant dense<0xFF800000> : vector<8xf32>
    %99 = vector.multi_reduction <maximumf>, %98, %cst_44 [1] : vector<8x8xf32> to vector<8xf32>
    %100 = vector.shape_cast %99 : vector<8xf32> to vector<8x1xf32>
    %101 = vector.broadcast %100 : vector<8x1xf32> to vector<8x8xf32>
    %102 = arith.subf %98, %101 : vector<8x8xf32>
    %103 = math.exp %102 : vector<8x8xf32>
    %cst_45 = arith.constant dense<0.000000e+00> : vector<8xf32>
    %104 = vector.multi_reduction <add>, %103, %cst_45 [1] : vector<8x8xf32> to vector<8xf32>
    %105 = vector.shape_cast %104 : vector<8xf32> to vector<8x1xf32>
    %106 = vector.broadcast %105 : vector<8x1xf32> to vector<8x8xf32>
    %107 = arith.divf %103, %106 : vector<8x8xf32>
    %cst_46 = arith.constant dense<0.000000e+00> : vector<8x8xf32>
    %108 = tpu.matmul %107, %89, %cst_46 {dimension_numbers = #tpu.dot_dimension_numbers<[1], [0], [0], [1], [0, 0, 1, 1], [], []>} : vector<8x8xf32>, vector<8x8xf32>, vector<8x8xf32> -> vector<8x8xf32>
    %109 = vector.extract_strided_slice %10 {offsets = [24, 0], sizes = [8, 32], strides = [1, 1]} : vector<32x32xf32> to vector<8x32xf32>
    %cst_47 = arith.constant dense<0.000000e+00> : vector<8x32xf32>
    %110 = tpu.matmul %108, %109, %cst_47 {dimension_numbers = #tpu.dot_dimension_numbers<[1], [0], [0], [1], [0, 0, 1, 1], [], []>} : vector<8x8xf32>, vector<8x32xf32>, vector<8x32xf32> -> vector<8x32xf32>
    %111 = arith.addf %86, %110 : vector<8x32xf32>
    %112 = arith.addf %111, %1 : vector<8x32xf32>
    %cst_48 = arith.constant dense<0.000000e+00> : vector<8xf32>
    %113 = vector.multi_reduction <add>, %112, %cst_48 [1] : vector<8x32xf32> to vector<8xf32>
    %114 = vector.shape_cast %113 : vector<8xf32> to vector<8x1xf32>
    %cst_49 = arith.constant 3.200000e+01 : f32
    %115 = vector.broadcast %cst_49 : f32 to vector<8x1xf32>
    %116 = arith.divf %114, %115 : vector<8x1xf32>
    %117 = vector.broadcast %116 : vector<8x1xf32> to vector<8x32xf32>
    %118 = arith.subf %112, %117 : vector<8x32xf32>
    %119 = arith.mulf %118, %118 : vector<8x32xf32>
    %cst_50 = arith.constant dense<0.000000e+00> : vector<8xf32>
    %120 = vector.multi_reduction <add>, %119, %cst_50 [1] : vector<8x32xf32> to vector<8xf32>
    %121 = vector.shape_cast %120 : vector<8xf32> to vector<8x1xf32>
    %cst_51 = arith.constant 3.200000e+01 : f32
    %122 = vector.broadcast %cst_51 : f32 to vector<8x1xf32>
    %123 = arith.divf %121, %122 : vector<8x1xf32>
    %124 = vector.broadcast %116 : vector<8x1xf32> to vector<8x32xf32>
    %125 = arith.subf %112, %124 : vector<8x32xf32>
    %cst_52 = arith.constant 9.99999974E-6 : f32
    %126 = vector.broadcast %cst_52 : f32 to vector<8x1xf32>
    %127 = arith.addf %123, %126 : vector<8x1xf32>
    %128 = math.rsqrt %127 : vector<8x1xf32>
    %129 = vector.broadcast %128 : vector<8x1xf32> to vector<8x32xf32>
    %130 = arith.mulf %125, %129 : vector<8x32xf32>
    %c0_53 = arith.constant 0 : index
    %c0_54 = arith.constant 0 : index
    %131 = vector.load %arg7[%c0_53, %c0_54] : memref<1x32xf32, #tpu.memory_space<vmem>>, vector<1x32xf32>
    %132 = vector.broadcast %131 : vector<1x32xf32> to vector<8x32xf32>
    %133 = arith.mulf %130, %132 : vector<8x32xf32>
    %c0_55 = arith.constant 0 : index
    %c0_56 = arith.constant 0 : index
    %134 = vector.load %arg8[%c0_55, %c0_56] : memref<1x32xf32, #tpu.memory_space<vmem>>, vector<1x32xf32>
    %135 = vector.broadcast %134 : vector<1x32xf32> to vector<8x32xf32>
    %136 = arith.addf %133, %135 : vector<8x32xf32>
    %c0_57 = arith.constant 0 : index
    %c0_58 = arith.constant 0 : index
    %c0_59 = arith.constant 0 : index
    %137 = vector.load %arg9[%c0_57, %c0_58, %c0_59] : memref<1x8x32xf32, #tpu.memory_space<vmem>>, vector<1x8x32xf32>
    %138 = vector.shape_cast %137 : vector<1x8x32xf32> to vector<8x32xf32>
    %139 = vector.shape_cast %136 : vector<8x32xf32> to vector<1x8x32xf32>
    tpu.vector_store %arg9[%c0_57, %c0_58, %c0_59], %139 {strides = array<i32>} : memref<1x8x32xf32, #tpu.memory_space<vmem>>, vector<1x8x32xf32>,
    return
  }
  func.func @transform_0(%arg0: i32) -> (i32, i32, i32) {
    %c0_i32 = arith.constant 0 : i32
    %c0_i32_0 = arith.constant 0 : i32
    %c0_i32_1 = arith.constant 0 : i32
    return %arg0, %c0_i32, %c0_i32_0 : i32, i32, i32
  }
  func.func @transform_1(%arg0: i32) -> (i32, i32) {
    %c0_i32 = arith.constant 0 : i32
    %c0_i32_0 = arith.constant 0 : i32
    %c0_i32_1 = arith.constant 0 : i32
    return %c0_i32, %c0_i32_0 : i32, i32
  }
  func.func @transform_2(%arg0: i32) -> (i32, i32) {
    %c0_i32 = arith.constant 0 : i32
    %c0_i32_0 = arith.constant 0 : i32
    %c0_i32_1 = arith.constant 0 : i32
    return %c0_i32, %c0_i32_0 : i32, i32
  }
  func.func @transform_3(%arg0: i32) -> (i32, i32) {
    %c0_i32 = arith.constant 0 : i32
    %c0_i32_0 = arith.constant 0 : i32
    %c0_i32_1 = arith.constant 0 : i32
    return %c0_i32, %c0_i32_0 : i32, i32
  }
  func.func @transform_4(%arg0: i32) -> (i32, i32) {
    %c0_i32 = arith.constant 0 : i32
    %c0_i32_0 = arith.constant 0 : i32
    %c0_i32_1 = arith.constant 0 : i32
    return %c0_i32, %c0_i32_0 : i32, i32
  }
  func.func @transform_5(%arg0: i32) -> (i32, i32, i32) {
    %c0_i32 = arith.constant 0 : i32
    %c0_i32_0 = arith.constant 0 : i32
    %c0_i32_1 = arith.constant 0 : i32
    return %arg0, %c0_i32, %c0_i32_0 : i32, i32, i32
  }
  func.func @transform_6(%arg0: i32) -> (i32, i32) {
    %c0_i32 = arith.constant 0 : i32
    %c0_i32_0 = arith.constant 0 : i32
    %c0_i32_1 = arith.constant 0 : i32
    return %c0_i32, %c0_i32_0 : i32, i32
  }
  func.func @transform_7(%arg0: i32) -> (i32, i32) {
    %c0_i32 = arith.constant 0 : i32
    %c0_i32_0 = arith.constant 0 : i32
    %c0_i32_1 = arith.constant 0 : i32
    return %c0_i32, %c0_i32_0 : i32, i32
  }
  func.func @transform_8(%arg0: i32) -> (i32, i32, i32) {
    %c0_i32 = arith.constant 0 : i32
    %c0_i32_0 = arith.constant 0 : i32
    %c0_i32_1 = arith.constant 0 : i32
    return %arg0, %c0_i32, %c0_i32_0 : i32, i32, i32
  }
}

</mosaic_0001>

<bundles_post_ra>
// kernel: tpu_custom_call.1
= control target key start
LH: loop header
LB: loop body
LE: loop exit
PB: predicated region body
PF: predicated region fallthrough
CT: control target
= control target key end

     0   :  { %s2760_s0 = inlined_call_operand.hbm [shape: f32[2,8,32], index: 0, kind: input, shape index: {}]   ;;  %s2761_s1 = inlined_call_operand.hbm [shape: f32[32,32], index: 1, kind: input, shape index: {}]   ;;  %s2762_s2 = inlined_call_operand.hbm [shape: f32[32,32], index: 2, kind: input, shape index: {}]   ;;  %s2763_s3 = inlined_call_operand.hbm [shape: f32[32,32], index: 3, kind: input, shape index: {}]   ;;  %s2764_s4 = inlined_call_operand.hbm [shape: f32[32,32], index: 4, kind: input, shape index: {}]   ;;  %s2765_s5 = inlined_call_operand.vmem [shape: f32[2,1,8], index: 5, kind: input, shape index: {}]   ;;  %s2766_s6 = inlined_call_operand.vmem [shape: f32[1,32], index: 6, kind: input, shape index: {}]   ;;  %s2767_s7 = inlined_call_operand.vmem [shape: f32[1,32], index: 7, kind: input, shape index: {}]   ;;  %s2768_s8 = inlined_call_operand.hbm [shape: f32[2,8,32], index: 8, kind: output, shape index: {}]  }
   0x1   :  { %2772 = sst [smem:[#allocation16_spill]] %s2761_s1 }
   0x2   :  { %13 = vsyncpa [#allocation3], 0 }
   0x3   :  { %15 = vsyncpa [#allocation3 + $0x1], 0 }
   0x4   :  { %16 = vsyncpa [#allocation6], 0 }
   0x5   :  { %17 = vsyncpa [#allocation9], 0 }
   0x6   :  { %18 = vsyncpa [#allocation4], 0 }
   0x7   :  { %20 = vsyncpa [#allocation4 + $0x1], 0  ;;  %s2337_s27 = smov 0   ;;  %s2339_s28 = smov 0  }
   0x8   :  { %s2341_s29 = smov 0   ;;  %s2343_s30 = smov 0  }
   0x9 LB: > { %s2277_s9 = smov [#allocation5]   ;;  %s2358_s11 = sadd.s32 4294967295, %s2275_s30   ;;  %s2275_s30 = sphi %s2343_s30, %s2794_s30   ;;  %s2271_s29 = sphi %s2341_s29, %s2793_s29   ;;  %s2267_s28 = sphi %s2339_s28, %s2792_s28   ;;  %s2263_s27 = sphi %s2337_s27, %s2791_s27  }
   0xa   : > { %s247_s10 = sshll.u32 %s2277_s9, 4  ;;  %p1755_p0 = scmp.ge.s32.totalorder %s2275_s30, 1  ;;  %s2363_s10 = int_to_ptr.vmem [resolvable:$true] %s247_s10 }
   0xb   : > { %p2769_p1 = scmp.eq.s32.totalorder %s2358_s11, 0  ;;  %p235_p2 = scmp.lt.s32.totalorder %s2275_s30, 3 }
   0xc   : > { %s2278_s13 = smov [#allocation8]   ;;  %s2279_s16 = smov [#allocation7]  }
   0xd   : > { %p2365_p3 = pnand %p1755_p0, %p235_p2  ;;  %s273_s14 = sshll.u32 %s2278_s13, 4  ;;  %s2378_s14 = int_to_ptr.vmem [resolvable:$true] %s273_s14 }
   0xe   : > { %s260_s17 = sshll.u32 %s2279_s16, 4  ;;  %s2775_s1 = sld [smem:[#allocation16_spill]]  ;;  %s2380_s17 = int_to_ptr.vmem [resolvable:$true] %s260_s17 }
   0xf   : > { %s2773_s12 = scalar_select %p2365_p3, 1, 0 }
  0x10   : > { %p1965_p5 = pneg %p2365_p3 }
  0x12   : > { %p2374_p6 = pnand %p1965_p5, %p2769_p1 }
  0x14   : > { %s2059_s20 = scalar_lea.hbm %s2775_s1, 512  ;;  %p2390_p8 = pneg %p2374_p6 }
  0x15   : > { %p2060_p7 = scmp.ne.s32.totalorder %s2775_s1, %s2059_s20  ;;  %p2066_p11 = scmp.lt.u32.totalorder %s2059_s20, %s2775_s1 }
  0x17   : > { %p2062_p9 = pnand %p2390_p8, %p2060_p7 }
  0x19   : > { %p2063_p10 = pneg %p2062_p9 }
  0x1b   : > { %p2068_p12 = pnand %p2066_p11, %p2063_p10 }
  0x1d   : > { %2071 = shalt.err (!%p2068_p12)
}
  0x1e   : > { %s2072_s26 = scalar_lea.vmem %s2363_s10, 512  ;;  %p2080_p5 = scmp.lt.s32.totalorder %s2363_s10, %s2363_s10 }
  0x1f   : > { %p2073_p13 = scmp.ne.s32.totalorder %s2363_s10, %s2072_s26  ;;  %p2081_p4 = scmp.lt.s32.totalorder %s2072_s26, %s2072_s26 }
  0x21   : > { %p2075_p0 = pnand %p2073_p13, %p2390_p8  ;;  %p2082_p7 = por %p2081_p4, %p2080_p5 }
  0x23   : > { %p2076_p2 = pneg %p2075_p0 }
  0x25   : > { %p2083_p9 = pnand %p2082_p7, %p2076_p2 }
  0x27   : > { %2086 = shalt.err (!%p2083_p9)
}
  0x28   : > { %s2280_s9 = smov 128   ;;  %s2281_s13 = smov 8  }
  0x29   : > { %1968 = dma.hbm_to_vmem [thread:$0]  (!%p2374_p6), %s2775_s1, 512, %s2363_s10, [#allocation6], %s2280_s9, %s2280_s9, %s2281_s13  }
  0x2a   : > { %s2087_s21 = scalar_lea.hbm %s2763_s3, 512 }
  0x2b   : > { %p2088_p4 = scmp.ne.s32.totalorder %s2763_s3, %s2087_s21  ;;  %p2094_p12 = scmp.lt.u32.totalorder %s2087_s21, %s2763_s3 }
  0x2d   : > { %p2090_p10 = pnand %p2088_p4, %p2390_p8 }
  0x2f   : > { %p2091_p11 = pneg %p2090_p10 }
  0x31   : > { %p2096_p13 = pnand %p2094_p12, %p2091_p11 }
  0x33   : > { %2099 = shalt.err (!%p2096_p13)
}
  0x34   : > { %s2100_s10 = scalar_lea.vmem %s2378_s14, 512  ;;  %p2108_p7 = scmp.lt.s32.totalorder %s2378_s14, %s2378_s14 }
  0x35   : > { %p2101_p0 = scmp.ne.s32.totalorder %s2378_s14, %s2100_s10  ;;  %p2109_p9 = scmp.lt.s32.totalorder %s2100_s10, %s2100_s10 }
  0x37   : > { %p2103_p2 = pnand %p2101_p0, %p2390_p8  ;;  %p2110_p4 = por %p2109_p9, %p2108_p7 }
  0x39   : > { %p2104_p5 = pneg %p2103_p2 }
  0x3b   : > { %p2111_p10 = pnand %p2110_p4, %p2104_p5 }
  0x3d   : > { %2114 = shalt.err (!%p2111_p10)
}
  0x3e   : > { %1974 = dma.hbm_to_vmem [thread:$0]  (!%p2374_p6), %s2763_s3, 512, %s2378_s14, [#allocation9], %s2280_s9, %s2280_s9, %s2281_s13  }
  0x3f   : > { %s2115_s21 = scalar_lea.hbm %s2762_s2, 512 }
  0x40   : > { %p2116_p11 = scmp.ne.s32.totalorder %s2762_s2, %s2115_s21  ;;  %p2122_p0 = scmp.lt.u32.totalorder %s2115_s21, %s2762_s2 }
  0x42   : > { %p2118_p12 = pnand %p2116_p11, %p2390_p8 }
  0x44   : > { %p2119_p13 = pneg %p2118_p12 }
  0x46   : > { %p2124_p2 = pnand %p2122_p0, %p2119_p13 }
  0x48   : > { %2127 = shalt.err (!%p2124_p2)
}
  0x49   : > { %s2128_s14 = scalar_lea.vmem %s2380_s17, 512  ;;  %p2136_p4 = scmp.lt.s32.totalorder %s2380_s17, %s2380_s17 }
  0x4a   : > { %p2129_p5 = scmp.ne.s32.totalorder %s2380_s17, %s2128_s14  ;;  %p2137_p10 = scmp.lt.s32.totalorder %s2128_s14, %s2128_s14 }
  0x4c   : > { %p2131_p7 = pnand %p2129_p5, %p2390_p8  ;;  %p2138_p11 = por %p2137_p10, %p2136_p4 }
  0x4e   : > { %p2132_p9 = pneg %p2131_p7 }
  0x50   : > { %p2139_p12 = pnand %p2138_p11, %p2132_p9 }
  0x52   : > { %2142 = shalt.err (!%p2139_p12)
}
  0x53   : > { %1971 = dma.hbm_to_vmem [thread:$0]  (!%p2374_p6), %s2762_s2, 512, %s2380_s17, [#allocation6], %s2280_s9, %s2280_s9, %s2281_s13  }
  0x54   : > { %s2282_s18 = smov [#allocation10]   ;;  %s2143_s22 = scalar_lea.hbm %s2764_s4, 512 }
  0x55   : > { %s286_s19 = sshll.u32 %s2282_s18, 4  ;;  %p2144_p13 = scmp.ne.s32.totalorder %s2764_s4, %s2143_s22  ;;  %s287_s19 = int_to_ptr.vmem [resolvable:$true] %s286_s19 }
  0x56   : > { %p2150_p5 = scmp.lt.u32.totalorder %s2143_s22, %s2764_s4 }
  0x57   : > { %p2146_p0 = pnand %p2144_p13, %p2390_p8 }
  0x59   : > { %p2147_p2 = pneg %p2146_p0 }
  0x5b   : > { %p2152_p7 = pnand %p2150_p5, %p2147_p2 }
  0x5d   : > { %2155 = shalt.err (!%p2152_p7)
}
  0x5e   : > { %s2156_s17 = scalar_lea.vmem %s287_s19, 512  ;;  %p2164_p11 = scmp.lt.s32.totalorder %s287_s19, %s287_s19 }
  0x5f   : > { %p2157_p9 = scmp.ne.s32.totalorder %s287_s19, %s2156_s17  ;;  %p2165_p12 = scmp.lt.s32.totalorder %s2156_s17, %s2156_s17 }
  0x61   : > { %p2159_p4 = pnand %p2157_p9, %p2390_p8  ;;  %p2166_p1 = por %p2165_p12, %p2164_p11 }
  0x63   : > { %p2160_p10 = pneg %p2159_p4 }
  0x65   : > { %p2167_p3 = pnand %p2166_p1, %p2160_p10 }
  0x67   : > { %2170 = shalt.err (!%p2167_p3)
}
  0x68   : > { %1977 = dma.hbm_to_vmem [thread:$0]  (!%p2374_p6), %s2764_s4, 512, %s287_s19, [#allocation9], %s2280_s9, %s2280_s9, %s2281_s13  }
  0x69   : > { %s1754_s15 = sadd.s32 4294967294, %s2275_s30   ;;  %s2489_s23 = sadd.s32 1, %s2275_s30  }
  0x6a   : > { %s30_s18 = ssub.s32 %s2275_s30, %s2489_s23  ;;  %s33_s20 = sadd.s32 1, %s2271_s29 }
  0x6b   : > { %p31_p1 = scmp.eq.s32.totalorder %s30_s18, 0  ;;  %p40_p3 = scmp.ne.s32.totalorder %s2271_s29, %s2267_s28 }
  0x6c   : > { %p41_p8 = scmp.eq.s32.totalorder %s2275_s30, 0  ;;  %p46_p13 = scmp.ne.s32.totalorder %s2267_s28, %s2263_s27 }
  0x6d   : > { %s2500_s21 = scalar_select %p31_p1, %s2271_s29, %s33_s20  }
  0x6e   : > { %p2502_p0 = por %p41_p8, %p40_p3  ;;  %p2778_p2 = scmp.eq.s32.totalorder %s2358_s11, 0 }
  0x6f   : > { %p222_p5 = scmp.eq.s32.totalorder %s2358_s11, 1  ;;  %p228_p7 = scmp.eq.s32.totalorder %s1754_s15, 1 }
  0x70   : > { %p2508_p6 = por %p2778_p2, %p46_p13  ;;  %p1990_p9 = scmp.lt.s32.totalorder %s2275_s30, 2 }
  0x71   : > { %s306_s13 = sand.u32 1, %s2271_s29   ;;  %p2515_p4 = por %p222_p5, %p40_p3 }
  0x72   : > { %p2519_p10 = por %p228_p7, %p46_p13  ;;  %s1761_s25 = sshll.u32 %s306_s13, 3 }
  0x73   : > { %s2780_s19 = scalar_select %p2515_p4, 1, 0 }
  0x74   : > { %s2781_s24 = scalar_select %p2519_p10, 1, 0 }
  0x75   : > { %s1762_s26 = sshll.u32 %s2275_s30, 7  ;;  %s310_s16 = scalar_lea.vmem [#allocation2], %s1761_s25 }
  0x76   : > { %s2527_s10 = scalar_lea.hbm %s2760_s0, %s1762_s26  ;;  %s317_s15 = sshll.u32 %s310_s16, 4  ;;  %s2529_s15 = int_to_ptr.vmem [resolvable:$true] %s317_s15 }
  0x77   : > { %p2533_p11 = pnand %p1990_p9, %p2502_p0  ;;  %s307_s20 = scalar_lea.sflag [#allocation3], %s306_s13 }
  0x78   : > { %s2171_s1 = scalar_lea.hbm %s2527_s10, 128  ;;  %s2176_s14 = scalar_lea.hbm %s2760_s0, 256 }
  0x79   : > { %p2172_p12 = scmp.ne.s32.totalorder %s2527_s10, %s2171_s1  ;;  %p2173_p1 = pneg %p2533_p11 }
  0x7a   : > { %p2177_p13 = scmp.lt.u32.totalorder %s2527_s10, %s2760_s0  ;;  %p2178_p0 = scmp.lt.u32.totalorder %s2176_s14, %s2171_s1 }
  0x7b   : > { %p2174_p3 = pnand %p2173_p1, %p2172_p12  ;;  %p2180_p5 = scmp.lt.u32.totalorder %s2171_s1, %s2527_s10 }
  0x7c   : > { %p2179_p2 = por %p2178_p0, %p2177_p13 }
  0x7d   : > { %p2175_p8 = pneg %p2174_p3 }
  0x7e   : > { %p2181_p7 = por %p2180_p5, %p2179_p2 }
  0x80   : > { %p2182_p9 = pnand %p2181_p7, %p2175_p8 }
  0x82   : > { %2185 = shalt.err (!%p2182_p9)
}
  0x83   : > { %s2186_s13 = scalar_lea.vmem %s2529_s15, 128  ;;  %s2283_s16 = smov [#allocation2]  }
  0x84   : > { %p2187_p12 = scmp.ne.s32.totalorder %s2529_s15, %s2186_s13  ;;  %s2191_s25 = sshll.u32 %s2283_s16, 4  ;;  %s2192_s25 = int_to_ptr.vmem [resolvable:$false] %s2191_s25 }
  0x85   : > { %s2193_s26 = scalar_lea.vmem %s2192_s25, 256  ;;  %p2194_p4 = scmp.lt.s32.totalorder %s2529_s15, %s2192_s25 }
  0x86   : > { %p2189_p3 = pnand %p2187_p12, %p2173_p1  ;;  %p2195_p13 = scmp.lt.s32.totalorder %s2193_s26, %s2186_s13 }
  0x88   : > { %p2190_p10 = pneg %p2189_p3  ;;  %p2196_p0 = por %p2195_p13, %p2194_p4 }
  0x8a   : > { %p2197_p2 = pnand %p2196_p0, %p2190_p10 }
  0x8c   : > { %2200 = shalt.err (!%p2197_p2)
}
  0x8d   : > { %1981 = dma.hbm_to_vmem [thread:$0]  (!%p2533_p11), %s2527_s10, 128, %s2529_s15, %s307_s20  }
  0x8e   : > { %p2783_p8 = scmp.ne.s32.totalorder %s2773_s12, 0 }
  0x8f   : > { %s2565_s1 = sand.u32 (!%p2783_p8), 1, %s2267_s28  }
  0x90   : > { %332 = sbr.rel (%p2783_p8) target bundleno = 3061 (0xbf5), region = 52  ;;  %s1764_s14 = sshll.u32 (!%p2783_p8), %s2565_s1, 3 }
  0x91   : > { %s335_s22 = scalar_lea.sflag (!%p2783_p8), [#allocation3], %s2565_s1  ;;  %s2571_s17 = scalar_lea.vmem (!%p2783_p8), [#allocation2], %s1764_s14 }
  0x97   : > { %2246 = dma.done.wait (%p2508_p6), %s335_s22, 128  }
  0x98   : > { %2248 = vsyncadd (%p2508_p6), %s335_s22, 4294967168  ;;  %p2784_p4 = scmp.eq.s32.totalorder %s2358_s11, 0 }
  0x9a   : > { %2250 = dma.done.wait (%p2784_p4), [#allocation6], 1024   ;;  %p2785_p10 = pmov %p2784_p4 }
  0x9b   : > { %p2786_p11 = pmov %p2784_p4 }
  0x9c   : > { %2252 = vsyncadd (%p2785_p10), [#allocation6], 4294966272 }
  0x9d   : > { %2254 = dma.done.wait (%p2786_p11), [#allocation9], 1024   ;;  %p2787_p1 = pmov %p2784_p4 }
  0x9e   : > { %v2284_v0 = vmov 0.0|0.0   ;;  %vm2285_vm0 = vmmov 0   ;;  %v2286_v1 = vmov 0.0   ;;  %v473_v2 = vld [vmem:[#allocation7] sm:$0xff]  ;;  %v474_v3 = vld [vmem:[#allocation7 + $0x8] sm:$0xff]  ;;  %v475_v7 = vld [vmem:[#allocation7 + $0x10] sm:$0xff]  ;;  %v705_v29 = vlaneseq }
  0x9f   : > { %2256 = vsyncadd (%p2787_p1), [#allocation9], 4294966272  ;;  %1933 = vmatprep.subr.bf16.mxu1 %v2284_v0  ;;  %1927 = vmatprep.subr.bf16.mxu0 %v2284_v0  ;;  %v395_v4 = vld [vmem:[#allocation5] sm:$0xff]  ;;  %v1934_v5 = vpack.c.bf16 %v474_v3, %v473_v2  ;;  %v396_v6 = vld [vmem:[#allocation5 + $0x8] sm:$0xff]  ;;  %vm399_vm1 = vcmask 261120   ;;  %vm625_vm2 = vcmask 64512  }
  0xa0   : > { %1853 = vmatprep.mubr.msk.f32.mxu1 %vm2285_vm0, %v2286_v1  ;;  %1842 = vmatprep.mubr.msk.f32.mxu0 %vm2285_vm0, %v2286_v1  ;;  %v476_v8 = vld [vmem:[#allocation7 + $0x18] sm:$0xff]  ;;  %v1928_v9 = vpack.c.bf16 %v396_v6, %v395_v4  ;;  %v397_v10 = vld [vmem:[#allocation5 + $0x10] sm:$0xff]  ;;  %v547_v15 = vld [vmem:[#allocation8] sm:$0xff]  ;;  %s2287_s12 = smov 120   ;;  %p390_p6 = scmp.lt.s32.totalorder %s2358_s11, 1  ;;  %v706_v31 = vshrl.u32 %v705_v29, 7 }
  0xa1   : > { %v398_v11 = vld [vmem:[#allocation5 + $0x18] sm:$0xff]  ;;  %1935 = vmatpush3.bf16.msra.mxu1 %v1934_v5  ;;  %v1937_v12 = vpack.c.bf16 %v476_v8, %v475_v7  ;;  %v548_v16 = vld [vmem:[#allocation8 + $0x8] sm:$0xff]  ;;  %v549_v17 = vld [vmem:[#allocation8 + $0x10] sm:$0xff]  ;;  %v2288_v33 = vmov 0   ;;  %s2289_s20 = smov 112   ;;  %s2290_s13 = smov 104  }
  0xa2   : > { %1929 = vmatpush3.bf16.msra.mxu0 %v1928_v9  ;;  %1936 = vmatprep.subr.bf16.mxu1 %v2284_v0  ;;  %v1931_v13 = vpack.c.bf16 %v398_v11, %v397_v10  ;;  %v2590_v14 = vld [vmem:[%s2571_s17] sm:$0xff]  ;;  %v1940_v18 = vpack.c.bf16 %v548_v16, %v547_v15  ;;  %s391_s9 = scalar_select %p390_p6, %s2358_s11, 1  ;;  %v707_v32 = vsub.s32 0, %v706_v31  ;;  %v622_v59 = vld [vmem:[#allocation10 + $0x8] sm:$0xff] }
  0xa3   : > { %1930 = vmatprep.subr.bf16.mxu0 %v2284_v0  ;;  %v550_v19 = vld [vmem:[#allocation8 + $0x18] sm:$0xff]  ;;  %s1792_s17 = sshll.u32 %s2358_s11, 7  ;;  %p2788_p7 = scmp.ne.s32.totalorder %s2780_s19, 0 }
  0xa4   : > { %v1943_v20 = vpack.c.bf16 %v550_v19, %v549_v17  ;;  %s392_s18 = scalar_lea.vmem %s2765_s5, %s391_s9  ;;  %s2291_s11 = smov [#allocation11]  }
  0xa5   : > { %1938 = vmatpush3.bf16.msra.mxu1 %v1937_v12  ;;  %v394_v30 = vld [vmem:[%s392_s18] sm:$0x1]  ;;  %s2715_s18 = scalar_lea.hbm %s2768_s8, %s1792_s17 }
  0xa6   : > { %1932 = vmatpush3.bf16.msra.mxu0 %v1931_v13  ;;  %1867 = vmatprep.subr.mxu1 %v2286_v1  ;;  %vm703_vm3 = vcmp.gt.f32.partialorder %v394_v30, 0.0 }
  0xa7   : > { %1939 = vmatprep.subr.bf16.mxu0 %v2284_v0  ;;  %v704_v34 = vsel %vm703_vm3, 1, %v2288_v33 }
  0xa8   : > { %1854 = vmatmul.mubr.msk.f32.vlgmr.msra.gmra.mrb[0].mxu1 %vm399_vm1, %v2590_v14  ;;  %v2635_v35 = vrot.slane %v704_v34, %v707_v32 }
  0xa9   : > { %1843 = vmatmul.mubr.msk.f32.vlgmr.msra.gmra.mrb[0].mxu0 %vm399_vm1, %v2590_v14  ;;  %1869 = vmatprep.mubr.msk.f32.mxu1 %vm2285_vm0, %v2286_v1 }
  0xaa   : > { %1864 = vmatprep.mubr.msk.f32.mxu0 %vm2285_vm0, %v2286_v1  ;;  %1941 = vmatpush3.bf16.msra.mxu0 %v1940_v18  ;;  %vm709_vm4 = vcmp.eq.s32.totalorder %v2635_v35, 1 }
  0xab   : > { %1942 = vmatprep.subr.bf16.mxu0 %v2284_v0  ;;  %v621_v0 = vld [vmem:[#allocation10] sm:$0xff] }
  0xae   : > { %1944 = vmatpush3.bf16.msra.mxu0 %v1943_v20 }
  0xaf   : > { %1877 = vmatprep.subr.mxu0 %v2286_v1 }
  0xb1   : > { %1865 = vmatmul.mubr.msk.f32.vlgmr.msra.gmra.mrb[2].mxu0 %vm399_vm1, %v2590_v14 }
  0xb2   : > { %1879 = vmatprep.mubr.msk.f32.mxu0 %vm2285_vm0, %v2286_v1 }
 0x17b   : > { %v2606_v21 = vpop.f32.mrb[0].mxu1 }
 0x17c   : > { %797 = vrot.lane.b32.xlu0 %v2606_v21, %s2287_s12  ;;  %v1855_v22 = vpop.f32.mrb[1].mxu1  ;;  %1868 = vmatpush3.xpose.msk.msra.mxu1 %vm625_vm2, %v2606_v21  ;;  %v2612_v23 = vpop.f32.mrb[0].mxu0 }
 0x17d   : > { %v1844_v24 = vpop.f32.mrb[1].mxu0  ;;  %1872 = vmatprep.subr.mxu1 %v2286_v1 }
 0x17f   : > { %1870 = vmatmul.mubr.msk.f32.vlgmr.msra.gmra.mrb[2].mxu1 %vm625_vm2, %v2612_v23 }
 0x180   : > { %795 = vrot.lane.b32.xlu0 %v2612_v23, %s2287_s12  ;;  %1874 = vmatprep.mubr.msk.f32.mxu1 %vm2285_vm0, %v2286_v1 }
 0x184   : > { %v2621_v25 = vpop.f32.mrb[2].mxu0 }
 0x185   : > { %v1866_v26 = vpop.f32.mrb[3].mxu0  ;;  %1873 = vmatpush3.msra.mxu1 %v2621_v25 }
 0x186   : > { %1882 = vmatprep.subr.mxu1 %v2286_v1 }
 0x1ee   : > { %v798_v27 = vpop.permute.xlu0 %797 }
 0x1ef   : > { %1878 = vmatpush3.xpose.msk.msra.mxu0 %vm625_vm2, %v798_v27 }
 0x1f0   : > { %1887 = vmatprep.subr.mxu0 %v2286_v1 }
 0x1f2   : > { %v796_v28 = vpop.permute.xlu0 %795 }
 0x1f3   : > { %1880 = vmatmul.mubr.msk.f32.vlgmr.msra.gmra.mrb[4].mxu0 %vm625_vm2, %v796_v28 }
 0x1f4   : > { %1889 = vmatprep.mubr.msk.f32.mxu0 %vm2285_vm0, %v2286_v1  ;;  %1888 = vmatpush3.msra.mxu0 %v622_v59 }
 0x1f5   : > { %1897 = vmatprep.subr.mxu0 %v2286_v1 }
 0x252   : > { %v698_v36 = vpop.f32.mrb[2].mxu1 }
 0x253   : > { %v702_v37 = vmul.f32 0.35355338, %v698_v36  ;;  %v1871_v38 = vpop.f32.mrb[3].mxu1 }
 0x255   : > { %v710_v39 = vsel %vm709_vm4, %v702_v37, -1000000.0 }
 0x256   : > { %v711_v40 = vsel %vm625_vm2, %v710_v39, -inf }
 0x257   : > { %712 = vmax.xlane.f32.xlu1 %v711_v40 }
 0x2c6   : > { %v869_v41 = vpop.f32.mrb[4].mxu0 }
 0x2c7   : > { %v873_v42 = vmul.f32 0.35355338, %v869_v41  ;;  %v1881_v43 = vpop.f32.mrb[5].mxu0 }
 0x2c9   : > { %v874_v44 = vsel %vm709_vm4, %v873_v42, -1000000.0 }
 0x2ca   : > { %v875_v45 = vsel %vm625_vm2, %v874_v44, -inf }
 0x2cb   : > { %876 = vmax.xlane.f32.xlu1 %v875_v45 }
 0x2e4   : > { %v713_v46 = vpop.xlane.xlu1 %712 }
 0x2e5   : > { %v714_v47 = vsub.f32 %v710_v39, %v713_v46 }
 0x2e7   : > { %v715_v48 = vmul.f32 1.442695, %v714_v47 }
 0x2e9   : > { %2041 = vpow2.f32 %v715_v48 }
 0x2f3   : > { %v2042_v49 = vpop.eup %2041 }
 0x2f4   : > { %v717_v50 = vsel %vm625_vm2, %v2042_v49, 0.0 }
 0x2f5   : > { %718 = vadd.xlane.f32.xlu0 %v717_v50 }
 0x30b   : > { %1200 = vrot.lane.b32.xlu0 %v2621_v25, %s2289_s20 }
 0x30f   : > { %1352 = vrot.lane.b32.xlu0 %v2606_v21, %s2290_s13 }
 0x358   : > { %v877_v51 = vpop.xlane.xlu1 %876 }
 0x359   : > { %v878_v52 = vsub.f32 %v874_v44, %v877_v51 }
 0x35b   : > { %v879_v53 = vmul.f32 1.442695, %v878_v52 }
 0x35d   : > { %2043 = vpow2.f32 %v879_v53 }
 0x367   : > { %v2044_v54 = vpop.eup %2043 }
 0x368   : > { %v881_v55 = vsel %vm625_vm2, %v2044_v54, 0.0 }
 0x369   : > { %882 = vadd.xlane.f32.xlu1 %v881_v55 }
 0x37a   : > { %887 = vrot.lane.b32.xlu1 %v2621_v25, %s2287_s12  ;;  %s389_s12 = scalar_lea.vmem [#allocation11], %s1764_s14  ;;  %s2205_s14 = sshll.u32 %s2291_s11, 4  ;;  %s2206_s14 = int_to_ptr.vmem [resolvable:$false] %s2205_s14 }
 0x37b   : > { %s1637_s9 = sshll.u32 %s389_s12, 4  ;;  %s2207_s16 = scalar_lea.vmem %s2206_s14, 256  ;;  %s2717_s9 = int_to_ptr.vmem [resolvable:$true] %s1637_s9 }
 0x37c   : > { %p2208_p3 = scmp.lt.s32.totalorder %s2717_s9, %s2206_s14 }
 0x37e   : > { %1111 = vrot.lane.b32.xlu1 %v2606_v21, %s2289_s20 }
 0x382   : > { %v719_v56 = vpop.xlane.xlu0 %718  ;;  %1109 = vrot.lane.b32.xlu1 %v2612_v23, %s2289_s20  ;;  %s1624_s20 = scalar_lea.sflag [#allocation4], %s2565_s1 }
 0x383   : > { %2045 = vrcp.f32 %v719_v56 }
 0x386   : > { %v1201_v3 = vpop.permute.xlu0 %1200 }
 0x38a   : > { %v1353_v27 = vpop.permute.xlu0 %1352 }
 0x38d   : > { %v2046_v57 = vpop.eup %2045 }
 0x38e   : > { %v721_v58 = vmul.f32 %v2046_v57, %v2042_v49 }
 0x390   : > { %1875 = vmatmul.mubr.msk.f32.vlgmr.msra.gmra.mrb[4].mxu1 %vm625_vm2, %v721_v58 }
 0x391   : > { %1884 = vmatprep.mubr.msk.f32.mxu1 %vm2285_vm0, %v2286_v1 }
 0x3f6   : > { %v883_v60 = vpop.xlane.xlu1 %882 }
 0x3f7   : > { %2047 = vrcp.f32 %v883_v60 }
 0x3fa   : > { %v888_v61 = vpop.permute.xlu1 %887 }
 0x3fb   : > { %1883 = vmatpush3.msra.mxu1 %v888_v61 }
 0x3fc   : > { %1892 = vmatprep.subr.mxu1 %v2286_v1 }
 0x3fe   : > { %v1112_v5 = vpop.permute.xlu1 %1111 }
 0x401   : > { %v2048_v62 = vpop.eup %2047 }
 0x402   : > { %v885_v63 = vmul.f32 %v2048_v62, %v2044_v54  ;;  %v1110_v8 = vpop.permute.xlu1 %1109 }
 0x404   : > { %1885 = vmatmul.mubr.msk.f32.vlgmr.msra.gmra.mrb[6].mxu1 %vm625_vm2, %v885_v63 }
 0x405   : > { %1893 = vmatpush3.msra.mxu1 %v621_v0  ;;  %1894 = vmatprep.mubr.msk.f32.mxu1 %vm2285_vm0, %v2286_v1 }
 0x406   : > { %1902 = vmatprep.subr.mxu1 %v2286_v1 }
 0x463   : > { %v791_v2 = vpop.f32.mrb[4].mxu1 }
 0x464   : > { %v1876_v4 = vpop.f32.mrb[5].mxu1  ;;  %1895 = vmatmul.mubr.msk.f32.vlgmr.msra.gmra.mrb[8].mxu1 %vm625_vm2, %v791_v2 }
 0x465   : > { %1903 = vmatpush3.msra.mxu1 %v1201_v3  ;;  %1904 = vmatprep.mubr.msk.f32.mxu1 %vm2285_vm0, %v2286_v1  ;;  %v1790_v4 = vld [vmem:[%s2767_s7] ss:$0 sm:$0xff] }
 0x466   : > { %1912 = vmatprep.subr.mxu1 %v2286_v1 }
 0x4d7   : > { %v959_v6 = vpop.f32.mrb[6].mxu1 }
 0x4d8   : > { %v1886_v7 = vpop.f32.mrb[7].mxu1  ;;  %1890 = vmatmul.mubr.msk.f32.vlgmr.msra.gmra.mrb[6].mxu0 %vm625_vm2, %v959_v6 }
 0x4d9   : > { %1898 = vmatpush3.xpose.msk.msra.mxu0 %vm625_vm2, %v1112_v5  ;;  %1899 = vmatprep.mubr.msk.f32.mxu0 %vm2285_vm0, %v2286_v1 }
 0x4da   : > { %1907 = vmatprep.subr.mxu0 %v2286_v1 }
 0x4dc   : > { %1900 = vmatmul.mubr.msk.f32.vlgmr.msra.gmra.mrb[8].mxu0 %vm625_vm2, %v1110_v8 }
 0x4dd   : > { %1909 = vmatprep.mubr.msk.f32.mxu0 %vm2285_vm0, %v2286_v1 }
 0x537   : > { %v1105_v9 = vpop.f32.mrb[8].mxu1 }
 0x538   : > { %v1896_v10 = vpop.f32.mrb[9].mxu1 }
 0x5ab   : > { %v1032_v11 = vpop.f32.mrb[6].mxu0 }
 0x5ac   : > { %v1106_v12 = vadd.f32 %v1105_v9, %v1032_v11  ;;  %v1891_v13 = vpop.f32.mrb[7].mxu0 }
 0x5af   : > { %v1183_v15 = vpop.f32.mrb[8].mxu0 }
 0x5b0   : > { %v1187_v16 = vmul.f32 0.35355338, %v1183_v15  ;;  %v1901_v17 = vpop.f32.mrb[9].mxu0 }
 0x5b2   : > { %v1188_v18 = vsel %vm709_vm4, %v1187_v16, -1000000.0 }
 0x5b3   : > { %v1189_v19 = vsel %vm625_vm2, %v1188_v18, -inf }
 0x5b4   : > { %1190 = vmax.xlane.f32.xlu1 %v1189_v19 }
 0x641   : > { %v1191_v20 = vpop.xlane.xlu1 %1190 }
 0x642   : > { %v1192_v21 = vsub.f32 %v1188_v18, %v1191_v20 }
 0x644   : > { %v1193_v22 = vmul.f32 1.442695, %v1192_v21 }
 0x646   : > { %2049 = vpow2.f32 %v1193_v22 }
 0x650   : > { %v2050_v24 = vpop.eup %2049 }
 0x651   : > { %v1195_v26 = vsel %vm625_vm2, %v2050_v24, 0.0 }
 0x652   : > { %1196 = vadd.xlane.f32.xlu0 %v1195_v26 }
 0x668   : > { %1350 = vrot.lane.b32.xlu0 %v2612_v23, %s2290_s13  ;;  %v623_v23 = vld [vmem:[#allocation10 + $0x10] sm:$0xff] }
 0x669   : > { %1908 = vmatpush3.msra.mxu0 %v623_v23 }
 0x66a   : > { %1917 = vmatprep.subr.mxu0 %v2286_v1 }
 0x6df   : > { %v1197_v28 = vpop.xlane.xlu0 %1196 }
 0x6e0   : > { %2051 = vrcp.f32 %v1197_v28 }
 0x6e3   : > { %v1351_v31 = vpop.permute.xlu0 %1350 }
 0x6ea   : > { %v2052_v29 = vpop.eup %2051 }
 0x6eb   : > { %v1199_v30 = vmul.f32 %v2052_v29, %v2050_v24 }
 0x6ed   : > { %1905 = vmatmul.mubr.msk.f32.vlgmr.msra.gmra.mrb[10].mxu1 %vm625_vm2, %v1199_v30 }
 0x6ee   : > { %1913 = vmatpush3.xpose.msk.msra.mxu1 %vm625_vm2, %v1353_v27  ;;  %1914 = vmatprep.mubr.msk.f32.mxu1 %vm2285_vm0, %v2286_v1 }
 0x6ef   : > { %1922 = vmatprep.subr.mxu1 %v2286_v1 }
 0x6f1   : > { %1915 = vmatmul.mubr.msk.f32.vlgmr.msra.gmra.mrb[12].mxu1 %vm625_vm2, %v1351_v31 }
 0x6f2   : > { %1924 = vmatprep.mubr.msk.f32.mxu1 %vm2285_vm0, %v2286_v1 }
 0x7c0   : > { %v1272_v32 = vpop.f32.mrb[10].mxu1 }
 0x7c1   : > { %v1906_v33 = vpop.f32.mrb[11].mxu1  ;;  %1910 = vmatmul.mubr.msk.f32.vlgmr.msra.gmra.mrb[10].mxu0 %vm625_vm2, %v1272_v32 }
 0x7c2   : > { %1919 = vmatprep.mubr.msk.f32.mxu0 %vm2285_vm0, %v2286_v1  ;;  %v624_v1 = vld [vmem:[#allocation10 + $0x18] sm:$0xff] }
 0x7c3   : > { %1923 = vmatpush3.msra.mxu1 %v624_v1 }
 0x7c4   : > { %v1424_v34 = vpop.f32.mrb[12].mxu1 }
 0x7c5   : > { %v1428_v36 = vmul.f32 0.35355338, %v1424_v34  ;;  %v1916_v37 = vpop.f32.mrb[13].mxu1 }
 0x7c7   : > { %v1429_v38 = vsel %vm709_vm4, %v1428_v36, -1000000.0 }
 0x7c8   : > { %v1430_v39 = vsel %vm625_vm2, %v1429_v38, -inf }
 0x7c9   : > { %1431 = vmax.xlane.f32.xlu0 %v1430_v39 }
 0x856   : > { %v1432_v40 = vpop.xlane.xlu0 %1431 }
 0x857   : > { %v1433_v41 = vsub.f32 %v1429_v38, %v1432_v40 }
 0x859   : > { %v1434_v42 = vmul.f32 1.442695, %v1433_v41 }
 0x85b   : > { %2053 = vpow2.f32 %v1434_v42 }
 0x865   : > { %v2054_v43 = vpop.eup %2053 }
 0x866   : > { %v1436_v44 = vsel %vm625_vm2, %v2054_v43, 0.0 }
 0x867   : > { %1437 = vadd.xlane.f32.xlu1 %v1436_v44 }
 0x878   : > { %1441 = vrot.lane.b32.xlu1 %v2621_v25, %s2290_s13  ;;  %s2201_s13 = scalar_lea.vmem %s2717_s9, 128 }
 0x879   : > { %p2202_p5 = scmp.ne.s32.totalorder %s2717_s9, %s2201_s13  ;;  %p2209_p13 = scmp.lt.s32.totalorder %s2207_s16, %s2201_s13 }
 0x87b   : > { %p2203_p9 = pnand %p2202_p5, %p2788_p7  ;;  %p2210_p0 = por %p2209_p13, %p2208_p3 }
 0x87d   : > { %p2204_p12 = pneg %p2203_p9 }
 0x87f   : > { %p2211_p2 = pnand %p2210_p0, %p2204_p12 }
 0x894   : > { %v1345_v45 = vpop.f32.mrb[10].mxu0 }
 0x895   : > { %v1349_v46 = vadd.f32 %v1345_v45, %v1106_v12  ;;  %v1911_v35 = vpop.f32.mrb[11].mxu0 }
 0x8f4   : > { %v1438_v47 = vpop.xlane.xlu1 %1437 }
 0x8f5   : > { %2055 = vrcp.f32 %v1438_v47 }
 0x8f8   : > { %v1442_v48 = vpop.permute.xlu1 %1441 }
 0x8f9   : > { %1918 = vmatpush3.msra.mxu0 %v1442_v48 }
 0x8ff   : > { %v2056_v49 = vpop.eup %2055 }
 0x900   : > { %v1440_v50 = vmul.f32 %v2056_v49, %v2054_v43 }
 0x902   : > { %1920 = vmatmul.mubr.msk.f32.vlgmr.msra.gmra.mrb[12].mxu0 %vm625_vm2, %v1440_v50 }
 0x9d5   : > { %v1513_v51 = vpop.f32.mrb[12].mxu0 }
 0x9d6   : > { %v1921_v52 = vpop.f32.mrb[13].mxu0  ;;  %1925 = vmatmul.mubr.msk.f32.vlgmr.msra.gmra.mrb[14].mxu1 %vm625_vm2, %v1513_v51 }
 0xaa9   : > { %v1586_v53 = vpop.f32.mrb[14].mxu1 }
 0xaaa   : > { %v1590_v54 = vadd.f32 %v1586_v53, %v1349_v46  ;;  %v1926_v25 = vpop.f32.mrb[15].mxu1 }
 0xaac   : > { %v1591_v55 = vadd.f32 %v1590_v54, %v2590_v14  ;;  %v1789_v14 = vld [vmem:[%s2766_s6] ss:$0 sm:$0xff] }
 0xaae   : > { %v1592_v56 = vsel %vm399_vm1, %v1591_v55, 0.0 }
 0xaaf   : > { %1593 = vadd.xlane.f32.xlu1 %v1592_v56 }
 0xb3c   : > { %v1594_v57 = vpop.xlane.xlu1 %1593 }
 0xb3d   : > { %v1596_v58 = vmul.f32 0.03125, %v1594_v57 }
 0xb3f   : > { %v1597_v59 = vsub.f32 %v1591_v55, %v1596_v58 }
 0xb41   : > { %v1598_v60 = vmul.f32 %v1597_v59, %v1597_v59 }
 0xb43   : > { %v1599_v61 = vsel %vm399_vm1, %v1598_v60, 0.0 }
 0xb44   : > { %1600 = vadd.xlane.f32.xlu0 %v1599_v61 }
 0xbd1   : > { %v1601_v62 = vpop.xlane.xlu0 %1600 }
 0xbd2   : > { %v1602_v63 = vmul.f32 0.03125, %v1601_v62 }
 0xbd4   : > { %v1603_v0 = vadd.f32 1e-05, %v1602_v63 }
 0xbd6   : > { %2057 = vrsqrt.f32 %v1603_v0 }
 0xbe0   : > { %v2058_v2 = vpop.eup %2057 }
 0xbe1   : > { %v1605_v3 = vmul.f32 %v2058_v2, %v1597_v59 }
 0xbe3   : > { %v1613_v5 = vmul.f32 %v1789_v14, %v1605_v3 }
 0xbe5   : > { %v1621_v6 = vadd.f32 %v1790_v4, %v1613_v5 }
 0xbe7   : > { %1622 = vst.msk [vmem:[%s389_s12] sm:$0xff] %vm399_vm1, %v1621_v6 }
 0xbe8   : > { %2214 = shalt.err (!%p2211_p2)
}
 0xbe9   : > { %s2215_s1 = scalar_lea.hbm %s2715_s18, 128  ;;  %s2219_s22 = scalar_lea.hbm %s2768_s8, 256 }
 0xbea   : > { %p2216_p8 = scmp.ne.s32.totalorder %s2715_s18, %s2215_s1  ;;  %p2220_p11 = scmp.lt.u32.totalorder %s2715_s18, %s2768_s8 }
 0xbeb   : > { %p2221_p1 = scmp.lt.u32.totalorder %s2219_s22, %s2215_s1  ;;  %p2223_p5 = scmp.lt.u32.totalorder %s2215_s1, %s2715_s18 }
 0xbec   : > { %p2217_p4 = pnand %p2216_p8, %p2788_p7 }
 0xbed   : > { %p2222_p6 = por %p2221_p1, %p2220_p11 }
 0xbee   : > { %p2218_p10 = pneg %p2217_p4 }
 0xbef   : > { %p2224_p9 = por %p2223_p5, %p2222_p6 }
 0xbf1   : > { %p2225_p12 = pnand %p2224_p9, %p2218_p10 }
 0xbf3   : > { %2228 = shalt.err (!%p2225_p12)
}
 0xbf4   : > { %1963 = dma.vmem_to_hbm [thread:$0]  (%p2788_p7), %s2717_s9, 128, %s2715_s18, %s1624_s20  }
 0xbf5 PF: > { %s1649_s10 = sand.u32 1, %s2263_s27   ;;  %p2789_p3 = scmp.ne.s32.totalorder %s2781_s24, 0 }
 0xbf6   : > { %p2790_p13 = scmp.ge.s32.totalorder %s2275_s30, 2  ;;  %s1650_s15 = scalar_lea.sflag [#allocation4], %s1649_s10 }
 0xbf8   : > { %p1983_p0 = pnand %p2790_p13, %p2789_p3 }
 0xbfa   : > { %2258 = dma.done.wait (!%p1983_p0), %s1650_s15, 128  }
 0xbfb   : > { %2260 = vsyncadd (!%p1983_p0), %s1650_s15, 4294967168  ;;  %p23_p2 = scmp.ge.s32.totalorder %s2489_s23, 4   ;;  %s2791_s27 = smov %s2267_s28 }
 0xbfc   : > { %s2792_s28 = smov %s2271_s29  ;;  %s2793_s29 = smov %s2500_s21 }
 0xbfd   : > { %s2794_s30 = smov %s2489_s23  ;;  %25 = sbr.rel (!%p23_p2) target bundleno = 9 (0x9), region = 116 }
 0xc04   :  { %1655 = vsyncpa [#allocation3], 1 }
 0xc05   :  { %1657 = vsyncpa [#allocation3 + $0x1], 1 }
 0xc06   :  { %1658 = vsyncpa [#allocation6], 1 }
 0xc07   :  { %1659 = vsyncpa [#allocation9], 1 }
 0xc08   :  { %1660 = vsyncpa [#allocation4], 1 }
 0xc09   :  { %1662 = vsyncpa [#allocation4 + $0x1], 1 }

</bundles_post_ra>
